<compile_context>
chip_gen: v6e
topology: v6e:2x2x1
jax: 0.10.0
libtpu: 0.0.40
codegen_flags: <defaults>
</compile_context>

<pallas_src>
import functools

import jax
import jax.numpy as jnp
from jax import lax
from jax.experimental import pallas as pl
from jax.experimental.pallas import tpu as pltpu

IN_FEATURES = 3
OUT_FEATURES = 5

# Sublane blocks (of 128 rows each) per grid step: 512 * 128 = 65536 rows.
# Double-buffered f32 VMEM footprint: (3+5+5)*512*128*4B*2 ~= 6.5 MiB,
# comfortably under the scoped-VMEM default on v5e/v6e/v7x.
TILE_ROWS = 512


def _round_up(x, m):
    return (x + m - 1) // m * m


def _linear_sub_relu_kernel(w_ref, x1_ref, x2_ref, o_ref, *, tile_rows, chunk):
    """o[n, r, l] = relu(x2[n, r, l] - sum_k w[n, k] * x1[k, r, l])

    w_ref : (OUT, IN)             f32 in SMEM (scalar reads, VPU broadcast)
    x1_ref: (IN,  tile_rows, 128) native dtype in VMEM
    x2_ref: (OUT, tile_rows, 128) native dtype in VMEM
    o_ref : (OUT, tile_rows, 128) out dtype    in VMEM (dense full-width vst)
    """
    n_chunks = tile_rows // chunk

    def body(c, carry):
        r0 = pl.multiple_of(c * chunk, chunk)
        # Load each x1 slab chunk once; reuse it across all 5 outputs.
        x1c = [
            x1_ref[k, pl.ds(r0, chunk), :].astype(jnp.float32)
            for k in range(IN_FEATURES)
        ]
        for n in range(OUT_FEATURES):
            acc = w_ref[n, 0] * x1c[0]
            for k in range(1, IN_FEATURES):
                acc = acc + w_ref[n, k] * x1c[k]
            x2c = x2_ref[n, pl.ds(r0, chunk), :].astype(jnp.float32)
            o_ref[n, pl.ds(r0, chunk), :] = jnp.maximum(x2c - acc, 0.0).astype(
                o_ref.dtype
            )
        return carry

    lax.fori_loop(0, n_chunks, body, 0, unroll=True)


def model_forward(x1, x2, weight):
    """relu(x2 - x1 @ weight.T); x1: (..., 3), x2: (..., 5), weight: (5, 3)."""
    lead = x1.shape[:-1]
    assert x1.shape[-1] == IN_FEATURES
    assert x2.shape == (*lead, OUT_FEATURES)

    # Match PyTorch type promotion: relu(x2 - x1 @ w.T).
    out_dtype = jnp.promote_types(
        jnp.promote_types(x1.dtype, weight.dtype), x2.dtype
    )

    M = 1
    for d in lead:
        M *= d
    M = max(M, 1)

    # --- tiling -----------------------------------------------------------
    row_blocks = pl.cdiv(M, 128)                       # 128-row lane groups
    tile_rows = min(TILE_ROWS, _round_up(row_blocks, 8))
    if row_blocks > 8:
        # Prefer >= 2 balanced grid steps so v7x's two TensorCores both work.
        tile_rows = min(tile_rows, _round_up(pl.cdiv(row_blocks, 2), 8))
    row_blocks_pad = _round_up(row_blocks, tile_rows)
    grid_m = row_blocks_pad // tile_rows
    m_pad = row_blocks_pad * 128

    # Inner chunk size (sublane rows) that divides tile_rows (multiple of 8).
    if tile_rows % 32 == 0:
        chunk = 32
    elif tile_rows % 16 == 0:
        chunk = 16
    else:
        chunk = 8

    # --- layout glue (native dtype kept through HBM) ----------------------
    x1f = x1.reshape(M, IN_FEATURES)
    x2f = x2.reshape(M, OUT_FEATURES)
    pad = m_pad - M
    if pad:
        x1f = jnp.pad(x1f, ((0, pad), (0, 0)))
        x2f = jnp.pad(x2f, ((0, pad), (0, 0)))
    # (features, row_blocks, 128): element [f, b, l] = row b*128 + l, feature f
    x1t = x1f.reshape(row_blocks_pad, 128, IN_FEATURES).transpose(2, 0, 1)
    x2t = x2f.reshape(row_blocks_pad, 128, OUT_FEATURES).transpose(2, 0, 1)
    w = weight.astype(jnp.float32)  # (OUT, IN) scalars for SMEM

    bytes_accessed = M * (
        IN_FEATURES * x1.dtype.itemsize
        + OUT_FEATURES * x2.dtype.itemsize
        + OUT_FEATURES * jnp.dtype(out_dtype).itemsize
    )

    kernel = functools.partial(
        _linear_sub_relu_kernel, tile_rows=tile_rows, chunk=chunk
    )

    out_t = pl.pallas_call(
        kernel,
        out_shape=jax.ShapeDtypeStruct(
            (OUT_FEATURES, row_blocks_pad, 128), out_dtype
        ),
        grid=(grid_m,),
        in_specs=[
            pl.BlockSpec(memory_space=pltpu.MemorySpace.SMEM),          # weight
            pl.BlockSpec((IN_FEATURES, tile_rows, 128), lambda i: (0, i, 0)),
            pl.BlockSpec((OUT_FEATURES, tile_rows, 128), lambda i: (0, i, 0)),
        ],
        out_specs=pl.BlockSpec(
            (OUT_FEATURES, tile_rows, 128), lambda i: (0, i, 0)
        ),
        compiler_params=pltpu.CompilerParams(
            dimension_semantics=("parallel",),
        ),
        cost_estimate=pl.CostEstimate(
            flops=35 * M, transcendentals=0, bytes_accessed=bytes_accessed
        ),
    )(w, x1t, x2t)

    # Undo the lane-dense layout and drop padded rows.
    out = out_t.transpose(1, 2, 0).reshape(m_pad, OUT_FEATURES)[:M]
    return out.reshape(*lead, OUT_FEATURES)


if __name__ == "__main__":
    key = jax.random.PRNGKey(0)
    k_w, k_x1, k_x2 = jax.random.split(key, 3)

    # Deterministic Linear(3, 5, bias=False) weight init.
    bound = 1.0 / (IN_FEATURES ** 0.5)
    weight = jax.random.uniform(
        k_w, (OUT_FEATURES, IN_FEATURES), jnp.float32, -bound, bound
    )

    # Small shapes consistent with the module: x1 (2, 4, 3), x2 (2, 4, 5).
    x1 = jax.random.normal(k_x1, (2, 4, IN_FEATURES), jnp.float32)
    x2 = jax.random.normal(k_x2, (2, 4, OUT_FEATURES), jnp.float32)

    fwd = jax.jit(model_forward)
    out = fwd(x1, x2, weight)
    jax.block_until_ready(out)

    # Pure-JAX reference.
    ref = jnp.maximum(x2 - jnp.einsum("bsk,nk->bsn", x1, weight), 0.0)
    assert out.shape == (2, 4, OUT_FEATURES)
    assert out.dtype == ref.dtype
    assert jnp.allclose(out, ref, atol=1e-5), "mismatch vs reference"

    print("KERNEL_OK")
</pallas_src>

<mosaic_0001>
module attributes {stable_mosaic.version = 11 : i64} {
  func.func @_linear_sub_relu_kernel(%arg0: i32, %arg1: memref<5x3xf32, #tpu.memory_space<smem>>, %arg2: memref<3x8x128xf32, #tpu.memory_space<vmem>>, %arg3: memref<5x8x128xf32, #tpu.memory_space<vmem>>, %arg4: memref<5x8x128xf32, #tpu.memory_space<vmem>>) attributes {dimension_semantics = [#tpu.dimension_semantics<parallel>], iteration_bounds = array<i64: 1>, scalar_prefetch = 0 : i64, scratch_operands = 0 : i64, tpu.core_type = #tpu.core_type<tc>, window_params = [{transform_indices = @transform_0, window_bounds = array<i64: 5, 3>}, {transform_indices = @transform_1, window_bounds = array<i64: 3, 8, 128>}, {transform_indices = @transform_2, window_bounds = array<i64: 5, 8, 128>}, {transform_indices = @transform_3, window_bounds = array<i64: 5, 8, 128>}]} {
    %c0_i32 = arith.constant 0 : i32
    %c8_i32 = arith.constant 8 : i32
    %0 = arith.muli %c0_i32, %c8_i32 : i32
    %1 = tpu.assume_multiple %0, 8 : i32
    %c0 = arith.constant 0 : index
    %2 = arith.index_cast %1 : i32 to index
    %c0_0 = arith.constant 0 : index
    %3 = vector.load %arg2[%c0, %2, %c0_0] : memref<3x8x128xf32, #tpu.memory_space<vmem>>, vector<1x8x128xf32>
    %4 = vector.shape_cast %3 : vector<1x8x128xf32> to vector<8x128xf32>
    %c1 = arith.constant 1 : index
    %5 = arith.index_cast %1 : i32 to index
    %c0_1 = arith.constant 0 : index
    %6 = vector.load %arg2[%c1, %5, %c0_1] : memref<3x8x128xf32, #tpu.memory_space<vmem>>, vector<1x8x128xf32>
    %7 = vector.shape_cast %6 : vector<1x8x128xf32> to vector<8x128xf32>
    %c2 = arith.constant 2 : index
    %8 = arith.index_cast %1 : i32 to index
    %c0_2 = arith.constant 0 : index
    %9 = vector.load %arg2[%c2, %8, %c0_2] : memref<3x8x128xf32, #tpu.memory_space<vmem>>, vector<1x8x128xf32>
    %10 = vector.shape_cast %9 : vector<1x8x128xf32> to vector<8x128xf32>
    %c0_3 = arith.constant 0 : index
    %c0_4 = arith.constant 0 : index
    %11 = memref.load %arg1[%c0_3, %c0_4] : memref<5x3xf32, #tpu.memory_space<smem>>
    %12 = vector.broadcast %11 : f32 to vector<8x128xf32>
    %13 = arith.mulf %12, %4 : vector<8x128xf32>
    %c0_5 = arith.constant 0 : index
    %c1_6 = arith.constant 1 : index
    %14 = memref.load %arg1[%c0_5, %c1_6] : memref<5x3xf32, #tpu.memory_space<smem>>
    %15 = vector.broadcast %14 : f32 to vector<8x128xf32>
    %16 = arith.mulf %15, %7 : vector<8x128xf32>
    %17 = arith.addf %13, %16 : vector<8x128xf32>
    %c0_7 = arith.constant 0 : index
    %c2_8 = arith.constant 2 : index
    %18 = memref.load %arg1[%c0_7, %c2_8] : memref<5x3xf32, #tpu.memory_space<smem>>
    %19 = vector.broadcast %18 : f32 to vector<8x128xf32>
    %20 = arith.mulf %19, %10 : vector<8x128xf32>
    %21 = arith.addf %17, %20 : vector<8x128xf32>
    %c0_9 = arith.constant 0 : index
    %22 = arith.index_cast %1 : i32 to index
    %c0_10 = arith.constant 0 : index
    %23 = vector.load %arg3[%c0_9, %22, %c0_10] : memref<5x8x128xf32, #tpu.memory_space<vmem>>, vector<1x8x128xf32>
    %24 = vector.shape_cast %23 : vector<1x8x128xf32> to vector<8x128xf32>
    %25 = arith.subf %24, %21 : vector<8x128xf32>
    %cst = arith.constant 0.000000e+00 : f32
    %26 = vector.broadcast %cst : f32 to vector<8x128xf32>
    %27 = arith.maximumf %25, %26 : vector<8x128xf32>
    %c0_11 = arith.constant 0 : index
    %28 = arith.index_cast %1 : i32 to index
    %c0_12 = arith.constant 0 : index
    %29 = vector.load %arg4[%c0_11, %28, %c0_12] : memref<5x8x128xf32, #tpu.memory_space<vmem>>, vector<1x8x128xf32>
    %30 = vector.shape_cast %29 : vector<1x8x128xf32> to vector<8x128xf32>
    %31 = vector.shape_cast %27 : vector<8x128xf32> to vector<1x8x128xf32>
    tpu.vector_store %arg4[%c0_11, %28, %c0_12], %31 {strides = array<i32>} : memref<5x8x128xf32, #tpu.memory_space<vmem>>, vector<1x8x128xf32>,
    %c1_13 = arith.constant 1 : index
    %c0_14 = arith.constant 0 : index
    %32 = memref.load %arg1[%c1_13, %c0_14] : memref<5x3xf32, #tpu.memory_space<smem>>
    %33 = vector.broadcast %32 : f32 to vector<8x128xf32>
    %34 = arith.mulf %33, %4 : vector<8x128xf32>
    %c1_15 = arith.constant 1 : index
    %c1_16 = arith.constant 1 : index
    %35 = memref.load %arg1[%c1_15, %c1_16] : memref<5x3xf32, #tpu.memory_space<smem>>
    %36 = vector.broadcast %35 : f32 to vector<8x128xf32>
    %37 = arith.mulf %36, %7 : vector<8x128xf32>
    %38 = arith.addf %34, %37 : vector<8x128xf32>
    %c1_17 = arith.constant 1 : index
    %c2_18 = arith.constant 2 : index
    %39 = memref.load %arg1[%c1_17, %c2_18] : memref<5x3xf32, #tpu.memory_space<smem>>
    %40 = vector.broadcast %39 : f32 to vector<8x128xf32>
    %41 = arith.mulf %40, %10 : vector<8x128xf32>
    %42 = arith.addf %38, %41 : vector<8x128xf32>
    %c1_19 = arith.constant 1 : index
    %43 = arith.index_cast %1 : i32 to index
    %c0_20 = arith.constant 0 : index
    %44 = vector.load %arg3[%c1_19, %43, %c0_20] : memref<5x8x128xf32, #tpu.memory_space<vmem>>, vector<1x8x128xf32>
    %45 = vector.shape_cast %44 : vector<1x8x128xf32> to vector<8x128xf32>
    %46 = arith.subf %45, %42 : vector<8x128xf32>
    %cst_21 = arith.constant 0.000000e+00 : f32
    %47 = vector.broadcast %cst_21 : f32 to vector<8x128xf32>
    %48 = arith.maximumf %46, %47 : vector<8x128xf32>
    %c1_22 = arith.constant 1 : index
    %49 = arith.index_cast %1 : i32 to index
    %c0_23 = arith.constant 0 : index
    %50 = vector.load %arg4[%c1_22, %49, %c0_23] : memref<5x8x128xf32, #tpu.memory_space<vmem>>, vector<1x8x128xf32>
    %51 = vector.shape_cast %50 : vector<1x8x128xf32> to vector<8x128xf32>
    %52 = vector.shape_cast %48 : vector<8x128xf32> to vector<1x8x128xf32>
    tpu.vector_store %arg4[%c1_22, %49, %c0_23], %52 {strides = array<i32>} : memref<5x8x128xf32, #tpu.memory_space<vmem>>, vector<1x8x128xf32>,
    %c2_24 = arith.constant 2 : index
    %c0_25 = arith.constant 0 : index
    %53 = memref.load %arg1[%c2_24, %c0_25] : memref<5x3xf32, #tpu.memory_space<smem>>
    %54 = vector.broadcast %53 : f32 to vector<8x128xf32>
    %55 = arith.mulf %54, %4 : vector<8x128xf32>
    %c2_26 = arith.constant 2 : index
    %c1_27 = arith.constant 1 : index
    %56 = memref.load %arg1[%c2_26, %c1_27] : memref<5x3xf32, #tpu.memory_space<smem>>
    %57 = vector.broadcast %56 : f32 to vector<8x128xf32>
    %58 = arith.mulf %57, %7 : vector<8x128xf32>
    %59 = arith.addf %55, %58 : vector<8x128xf32>
    %c2_28 = arith.constant 2 : index
    %c2_29 = arith.constant 2 : index
    %60 = memref.load %arg1[%c2_28, %c2_29] : memref<5x3xf32, #tpu.memory_space<smem>>
    %61 = vector.broadcast %60 : f32 to vector<8x128xf32>
    %62 = arith.mulf %61, %10 : vector<8x128xf32>
    %63 = arith.addf %59, %62 : vector<8x128xf32>
    %c2_30 = arith.constant 2 : index
    %64 = arith.index_cast %1 : i32 to index
    %c0_31 = arith.constant 0 : index
    %65 = vector.load %arg3[%c2_30, %64, %c0_31] : memref<5x8x128xf32, #tpu.memory_space<vmem>>, vector<1x8x128xf32>
    %66 = vector.shape_cast %65 : vector<1x8x128xf32> to vector<8x128xf32>
    %67 = arith.subf %66, %63 : vector<8x128xf32>
    %cst_32 = arith.constant 0.000000e+00 : f32
    %68 = vector.broadcast %cst_32 : f32 to vector<8x128xf32>
    %69 = arith.maximumf %67, %68 : vector<8x128xf32>
    %c2_33 = arith.constant 2 : index
    %70 = arith.index_cast %1 : i32 to index
    %c0_34 = arith.constant 0 : index
    %71 = vector.load %arg4[%c2_33, %70, %c0_34] : memref<5x8x128xf32, #tpu.memory_space<vmem>>, vector<1x8x128xf32>
    %72 = vector.shape_cast %71 : vector<1x8x128xf32> to vector<8x128xf32>
    %73 = vector.shape_cast %69 : vector<8x128xf32> to vector<1x8x128xf32>
    tpu.vector_store %arg4[%c2_33, %70, %c0_34], %73 {strides = array<i32>} : memref<5x8x128xf32, #tpu.memory_space<vmem>>, vector<1x8x128xf32>,
    %c3 = arith.constant 3 : index
    %c0_35 = arith.constant 0 : index
    %74 = memref.load %arg1[%c3, %c0_35] : memref<5x3xf32, #tpu.memory_space<smem>>
    %75 = vector.broadcast %74 : f32 to vector<8x128xf32>
    %76 = arith.mulf %75, %4 : vector<8x128xf32>
    %c3_36 = arith.constant 3 : index
    %c1_37 = arith.constant 1 : index
    %77 = memref.load %arg1[%c3_36, %c1_37] : memref<5x3xf32, #tpu.memory_space<smem>>
    %78 = vector.broadcast %77 : f32 to vector<8x128xf32>
    %79 = arith.mulf %78, %7 : vector<8x128xf32>
    %80 = arith.addf %76, %79 : vector<8x128xf32>
    %c3_38 = arith.constant 3 : index
    %c2_39 = arith.constant 2 : index
    %81 = memref.load %arg1[%c3_38, %c2_39] : memref<5x3xf32, #tpu.memory_space<smem>>
    %82 = vector.broadcast %81 : f32 to vector<8x128xf32>
    %83 = arith.mulf %82, %10 : vector<8x128xf32>
    %84 = arith.addf %80, %83 : vector<8x128xf32>
    %c3_40 = arith.constant 3 : index
    %85 = arith.index_cast %1 : i32 to index
    %c0_41 = arith.constant 0 : index
    %86 = vector.load %arg3[%c3_40, %85, %c0_41] : memref<5x8x128xf32, #tpu.memory_space<vmem>>, vector<1x8x128xf32>
    %87 = vector.shape_cast %86 : vector<1x8x128xf32> to vector<8x128xf32>
    %88 = arith.subf %87, %84 : vector<8x128xf32>
    %cst_42 = arith.constant 0.000000e+00 : f32
    %89 = vector.broadcast %cst_42 : f32 to vector<8x128xf32>
    %90 = arith.maximumf %88, %89 : vector<8x128xf32>
    %c3_43 = arith.constant 3 : index
    %91 = arith.index_cast %1 : i32 to index
    %c0_44 = arith.constant 0 : index
    %92 = vector.load %arg4[%c3_43, %91, %c0_44] : memref<5x8x128xf32, #tpu.memory_space<vmem>>, vector<1x8x128xf32>
    %93 = vector.shape_cast %92 : vector<1x8x128xf32> to vector<8x128xf32>
    %94 = vector.shape_cast %90 : vector<8x128xf32> to vector<1x8x128xf32>
    tpu.vector_store %arg4[%c3_43, %91, %c0_44], %94 {strides = array<i32>} : memref<5x8x128xf32, #tpu.memory_space<vmem>>, vector<1x8x128xf32>,
    %c4 = arith.constant 4 : index
    %c0_45 = arith.constant 0 : index
    %95 = memref.load %arg1[%c4, %c0_45] : memref<5x3xf32, #tpu.memory_space<smem>>
    %96 = vector.broadcast %95 : f32 to vector<8x128xf32>
    %97 = arith.mulf %96, %4 : vector<8x128xf32>
    %c4_46 = arith.constant 4 : index
    %c1_47 = arith.constant 1 : index
    %98 = memref.load %arg1[%c4_46, %c1_47] : memref<5x3xf32, #tpu.memory_space<smem>>
    %99 = vector.broadcast %98 : f32 to vector<8x128xf32>
    %100 = arith.mulf %99, %7 : vector<8x128xf32>
    %101 = arith.addf %97, %100 : vector<8x128xf32>
    %c4_48 = arith.constant 4 : index
    %c2_49 = arith.constant 2 : index
    %102 = memref.load %arg1[%c4_48, %c2_49] : memref<5x3xf32, #tpu.memory_space<smem>>
    %103 = vector.broadcast %102 : f32 to vector<8x128xf32>
    %104 = arith.mulf %103, %10 : vector<8x128xf32>
    %105 = arith.addf %101, %104 : vector<8x128xf32>
    %c4_50 = arith.constant 4 : index
    %106 = arith.index_cast %1 : i32 to index
    %c0_51 = arith.constant 0 : index
    %107 = vector.load %arg3[%c4_50, %106, %c0_51] : memref<5x8x128xf32, #tpu.memory_space<vmem>>, vector<1x8x128xf32>
    %108 = vector.shape_cast %107 : vector<1x8x128xf32> to vector<8x128xf32>
    %109 = arith.subf %108, %105 : vector<8x128xf32>
    %cst_52 = arith.constant 0.000000e+00 : f32
    %110 = vector.broadcast %cst_52 : f32 to vector<8x128xf32>
    %111 = arith.maximumf %109, %110 : vector<8x128xf32>
    %c4_53 = arith.constant 4 : index
    %112 = arith.index_cast %1 : i32 to index
    %c0_54 = arith.constant 0 : index
    %113 = vector.load %arg4[%c4_53, %112, %c0_54] : memref<5x8x128xf32, #tpu.memory_space<vmem>>, vector<1x8x128xf32>
    %114 = vector.shape_cast %113 : vector<1x8x128xf32> to vector<8x128xf32>
    %115 = vector.shape_cast %111 : vector<8x128xf32> to vector<1x8x128xf32>
    tpu.vector_store %arg4[%c4_53, %112, %c0_54], %115 {strides = array<i32>} : memref<5x8x128xf32, #tpu.memory_space<vmem>>, vector<1x8x128xf32>,
    %c1_i32 = arith.constant 1 : i32
    return
  }
  func.func @transform_0(%arg0: i32) -> (i32, i32) {
    %c0_i32 = arith.constant 0 : i32
    %c0_i32_0 = arith.constant 0 : i32
    %c0_i32_1 = arith.constant 0 : i32
    return %c0_i32, %c0_i32_0 : i32, i32
  }
  func.func @transform_1(%arg0: i32) -> (i32, i32, i32) {
    %c0_i32 = arith.constant 0 : i32
    %c0_i32_0 = arith.constant 0 : i32
    %c0_i32_1 = arith.constant 0 : i32
    return %c0_i32, %arg0, %c0_i32_0 : i32, i32, i32
  }
  func.func @transform_2(%arg0: i32) -> (i32, i32, i32) {
    %c0_i32 = arith.constant 0 : i32
    %c0_i32_0 = arith.constant 0 : i32
    %c0_i32_1 = arith.constant 0 : i32
    return %c0_i32, %arg0, %c0_i32_0 : i32, i32, i32
  }
  func.func @transform_3(%arg0: i32) -> (i32, i32, i32) {
    %c0_i32 = arith.constant 0 : i32
    %c0_i32_0 = arith.constant 0 : i32
    %c0_i32_1 = arith.constant 0 : i32
    return %c0_i32, %arg0, %c0_i32_0 : i32, i32, i32
  }
}

</mosaic_0001>

<bundles_post_ra>
// kernel: model_forward.1
= control target key start
LH: loop header
LB: loop body
LE: loop exit
PB: predicated region body
PF: predicated region fallthrough
CT: control target
= control target key end

     0   :  { %8 = vsyncpa [#allocation3], 0  ;;  %s236_s0 = inlined_call_operand.vmem [shape: f32[5,3], index: 0, kind: input, shape index: {}]   ;;  %s237_s1 = inlined_call_operand.vmem [shape: f32[3,8,128], index: 1, kind: input, shape index: {}]   ;;  %s238_s2 = inlined_call_operand.vmem [shape: f32[5,8,128], index: 2, kind: input, shape index: {}]   ;;  %s239_s3 = inlined_call_operand.vmem [shape: f32[5,8,128], index: 3, kind: output, shape index: {}]  }
   0x1   :  { %s15_s14 = sshll.u32 %s236_s0, 4  ;;  %s16_s14 = int_to_ptr.vmem [resolvable:$true] %s15_s14 }
   0x2   :  { %s159_s15 = scalar_lea.vmem %s16_s14, 128  ;;  %p164_p1 = scmp.lt.s32.totalorder %s16_s14, %s16_s14 }
   0x3   :  { %p160_p0 = scmp.ne.s32.totalorder %s16_s14, %s159_s15  ;;  %p165_p2 = scmp.lt.s32.totalorder %s159_s15, %s159_s15 }
   0x5   :  { %p166_p3 = por %p165_p2, %p164_p1 }
   0x7   :  { %p167_p4 = pnand %p166_p3, %p160_p0 }
   0x9   :  { %170 = shalt.err (!%p167_p4)
}
   0xa   :  { %s173_s16 = smov [#allocation2]  }
   0xb   :  { %18 = dma.vmem_to_smem %s16_s14, 128, %s173_s16, [#allocation3]  }
   0xc   :  { %171 = dma.done.wait [#allocation3], 128  }
   0xd   :  { %172 = vsyncadd [#allocation3], 4294967168 }
   0xe   :  { %26 = sfence }
   0xf   :  { %s34_s17 = sld [smem:[#allocation2]]  ;;  %v27_v0 = vld [vmem:[%s237_s1] sm:$0xff]  ;;  %v134_v1 = vld [vmem:[%s237_s1 + $0x8] sm:$0xff]  ;;  %v135_v2 = vld [vmem:[%s237_s1 + $0x10] sm:$0xff] }
  0x10   :  { %s136_s18 = sld [smem:[#allocation2 + $0x1]]  ;;  %v45_v13 = vld [vmem:[%s238_s2] sm:$0xff]  ;;  %v141_v23 = vld [vmem:[%s238_s2 + $0x8] sm:$0xff]  ;;  %v146_v34 = vld [vmem:[%s238_s2 + $0x10] sm:$0xff] }
  0x11   :  { %s137_s19 = sld [smem:[#allocation2 + $0x2]]  ;;  %v151_v45 = vld [vmem:[%s238_s2 + $0x18] sm:$0xff]  ;;  %v156_v53 = vld [vmem:[%s238_s2 + $0x20] sm:$0xff] }
  0x12   :  { %s138_s20 = sld [smem:[#allocation2 + $0x80]] }
  0x13   :  { %s139_s0 = sld [smem:[#allocation2 + $0x81]] }
  0x14   :  { %s140_s25 = sld [smem:[#allocation2 + $0x82]] }
  0x15   :  { %v35_v3 = vstv %s34_s17  ;;  %s143_s28 = sld [smem:[#allocation2 + $0x100]] }
  0x16   :  { %v36_v4 = vmul.f32 %v35_v3, %v27_v0  ;;  %v38_v5 = vstv %s136_s18  ;;  %s144_s29 = sld [smem:[#allocation2 + $0x101]] }
  0x17   :  { %v39_v6 = vmul.f32 %v134_v1, %v38_v5  ;;  %v42_v7 = vstv %s137_s19  ;;  %s145_s30 = sld [smem:[#allocation2 + $0x102]] }
  0x18   :  { %v43_v8 = vmul.f32 %v135_v2, %v42_v7  ;;  %v50_v9 = vstv %s138_s20  ;;  %s148_s4 = sld [smem:[#allocation2 + $0x180]] }
  0x19   :  { %v40_v10 = vadd.f32 %v39_v6, %v36_v4  ;;  %v51_v11 = vmul.f32 %v50_v9, %v27_v0  ;;  %v53_v12 = vstv %s139_s0  ;;  %s149_s5 = sld [smem:[#allocation2 + $0x181]] }
  0x1a   :  { %v54_v14 = vmul.f32 %v134_v1, %v53_v12  ;;  %v57_v15 = vstv %s140_s25  ;;  %s150_s1 = sld [smem:[#allocation2 + $0x182]] }
  0x1b   :  { %v44_v16 = vadd.f32 %v43_v8, %v40_v10  ;;  %v58_v17 = vmul.f32 %v135_v2, %v57_v15  ;;  %v67_v18 = vstv %s143_s28  ;;  %s153_s8 = sld [smem:[#allocation2 + $0x200]] }
  0x1c   :  { %v55_v19 = vadd.f32 %v54_v14, %v51_v11  ;;  %v68_v20 = vmul.f32 %v67_v18, %v27_v0  ;;  %v70_v21 = vstv %s144_s29  ;;  %s154_s9 = sld [smem:[#allocation2 + $0x201]] }
  0x1d   :  { %v46_v22 = vsub.f32 %v45_v13, %v44_v16  ;;  %v71_v24 = vmul.f32 %v134_v1, %v70_v21  ;;  %v74_v25 = vstv %s145_s30  ;;  %s155_s12 = sld [smem:[#allocation2 + $0x202]] }
  0x1e   :  { %v59_v26 = vadd.f32 %v58_v17, %v55_v19  ;;  %v75_v27 = vmul.f32 %v135_v2, %v74_v25  ;;  %v84_v28 = vstv %s148_s4 }
  0x1f   :  { %v47_v29 = vmax.f32 %v46_v22, 0.0  ;;  %v72_v30 = vadd.f32 %v71_v24, %v68_v20  ;;  %v85_v31 = vmul.f32 %v84_v28, %v27_v0  ;;  %v87_v32 = vstv %s149_s5 }
  0x20   :  { %v62_v33 = vsub.f32 %v141_v23, %v59_v26  ;;  %v88_v35 = vmul.f32 %v134_v1, %v87_v32  ;;  %v91_v36 = vstv %s150_s1 }
  0x21   :  { %48 = vst [vmem:[%s239_s3] sm:$0xff] %v47_v29  ;;  %v76_v37 = vadd.f32 %v75_v27, %v72_v30  ;;  %v92_v38 = vmul.f32 %v135_v2, %v91_v36  ;;  %v102_v39 = vstv %s153_s8 }
  0x22   :  { %v63_v40 = vmax.f32 %v62_v33, 0.0  ;;  %v89_v41 = vadd.f32 %v88_v35, %v85_v31  ;;  %v103_v42 = vmul.f32 %v102_v39, %v27_v0  ;;  %v105_v43 = vstv %s154_s9 }
  0x23   :  { %v79_v44 = vsub.f32 %v146_v34, %v76_v37  ;;  %v106_v46 = vmul.f32 %v134_v1, %v105_v43  ;;  %v109_v47 = vstv %s155_s12 }
  0x24   :  { %142 = vst [vmem:[%s239_s3 + $0x8] sm:$0xff] %v63_v40  ;;  %v93_v48 = vadd.f32 %v92_v38, %v89_v41  ;;  %v110_v49 = vmul.f32 %v135_v2, %v109_v47 }
  0x25   :  { %v80_v50 = vmax.f32 %v79_v44, 0.0  ;;  %v107_v51 = vadd.f32 %v106_v46, %v103_v42 }
  0x26   :  { %v97_v52 = vsub.f32 %v151_v45, %v93_v48 }
  0x27   :  { %147 = vst [vmem:[%s239_s3 + $0x10] sm:$0xff] %v80_v50  ;;  %v111_v54 = vadd.f32 %v110_v49, %v107_v51 }
  0x28   :  { %v98_v55 = vmax.f32 %v97_v52, 0.0 }
  0x29   :  { %v115_v56 = vsub.f32 %v156_v53, %v111_v54 }
  0x2a   :  { %152 = vst [vmem:[%s239_s3 + $0x18] sm:$0xff] %v98_v55 }
  0x2b   :  { %v116_v57 = vmax.f32 %v115_v56, 0.0 }
  0x2d   :  { %157 = vst [vmem:[%s239_s3 + $0x20] sm:$0xff] %v116_v57 }
  0x2e   :  { %123 = vsyncpa [#allocation3], 1 }

</bundles_post_ra>
